<compile_context>
chip_gen: v6e
topology: v6e:2x2x1
jax: 0.10.0
libtpu: 0.0.40
codegen_flags: <defaults>
</compile_context>

<pallas_src>
import functools

import jax
import jax.numpy as jnp
import numpy as np
from jax.experimental import pallas as pl
from jax.experimental.pallas import tpu as pltpu

EPS = 1e-12  # matches the module spec (eps=EPS), not the PyTorch default 1e-5

# Leave headroom below v7x's 64 MiB physical VMEM per TensorCore.
_VMEM_LIMIT_BYTES = 48 * 1024 * 1024


def _round_up(n, m):
    return ((n + m - 1) // m) * m


# --------------------------------------------------------------------------
# Kernel 1: pointwise (1x1) conv (bf16 MXU matmul) + per-tile partial stats
# --------------------------------------------------------------------------
def _pointwise_stats_kernel(x_ref, w_ref, x1_ref, stats_ref):
    # x_ref: (T, Ci) bf16, w_ref: (Ci, Co) bf16 (resident).
    y = jnp.dot(x_ref[...], w_ref[...], preferred_element_type=jnp.float32)
    yb = y.astype(jnp.bfloat16)
    x1_ref[...] = yb                                   # bf16 activation to HBM
    # Stats on the bf16-rounded values (what kernel 2 will actually normalize).
    yf = yb.astype(jnp.float32)
    s = jnp.sum(yf, axis=0, keepdims=True)             # (1, Co)
    ss = jnp.sum(yf * yf, axis=0, keepdims=True)       # (1, Co)
    stats_ref[0] = jnp.concatenate([s, ss], axis=0)    # single (2, Co) store


# --------------------------------------------------------------------------
# Kernel 2: BN affine (once) + zero pad + 3x3 stride-2 conv (9 MXU matmuls)
#           + bias + ReLU, per batch element.
# --------------------------------------------------------------------------
def _norm_conv_relu_kernel(x1_ref, scale_ref, shift_ref, w_ref, b_ref, o_ref,
                           p00, p01, p10, p11, *, Ho, Wo, Co):
    # Stride-(2,2) phase decomposition of the zero-padded normalized image
    # xp[r, c] = xn[r-1, c-1] (1-pixel halo):
    #     p<a><b>[i, j, :] == xp[2*i + a, 2*j + b, :]
    # Only phase a=0 needs the top pad row and only phase b=0 needs the left
    # pad column (bottom/right pads are never read by a 3x3 stride-2 conv).
    # p00/p10 allocate 8 extra leading columns so the big interior store starts
    # sublane-aligned; the zero pad column lives at index 7.
    C0 = 7   # pad column index in p00 / p10
    D0 = 8   # first data column in p00 / p10

    # ---- zero the pad row / column that the taps actually read -------------
    # (done every grid step: scratch is uninitialized and per-core)
    p00[0:1, :, :] = jnp.zeros((1, Wo + 8, Co), jnp.bfloat16)        # top row
    p01[0:1, :, :] = jnp.zeros((1, Wo, Co), jnp.bfloat16)            # top row
    p00[:, C0:C0 + 1, :] = jnp.zeros((Ho + 1, 1, Co), jnp.bfloat16)  # left col
    p10[:, C0:C0 + 1, :] = jnp.zeros((Ho, 1, Co), jnp.bfloat16)      # left col

    # ---- BatchNorm affine applied ONCE (f32), then phase split (bf16) ------
    xn = x1_ref[0].astype(jnp.float32) * scale_ref[...] + shift_ref[...]
    xnb = xn.astype(jnp.bfloat16).reshape(Ho, 2, Wo, 2, Co)
    p11[:, :, :] = xnb[:, 0, :, 0, :]                   # even rows, even cols
    p10[:, D0:D0 + Wo, :] = xnb[:, 0, :, 1, :]          # even rows, odd  cols
    p01[1:Ho + 1, :, :] = xnb[:, 1, :, 0, :]            # odd  rows, even cols
    p00[1:Ho + 1, D0:D0 + Wo, :] = xnb[:, 1, :, 1, :]   # odd  rows, odd  cols

    # ---- 3x3 stride-(2,2) conv: 9 MXU matmuls into a traced f32 accumulator
    # tap (kh, kw): patch[i, j, :] = xp[2*i + kh, 2*j + kw, :]
    tap_slices = (
        (p00, 0, C0),   # (0, 0)
        (p01, 0, 0),    # (0, 1)
        (p00, 0, D0),   # (0, 2)
        (p10, 0, C0),   # (1, 0)
        (p11, 0, 0),    # (1, 1)
        (p10, 0, D0),   # (1, 2)
        (p00, 1, C0),   # (2, 0)
        (p01, 1, 0),    # (2, 1)
        (p00, 1, D0),   # (2, 2)
    )
    acc = jnp.zeros((Ho * Wo, Co), jnp.float32)
    for t, (ref, r0, c0) in enumerate(tap_slices):
        patch = ref[r0:r0 + Ho, c0:c0 + Wo, :].reshape(Ho * Wo, Co)
        acc = acc + jnp.dot(patch, w_ref[t], preferred_element_type=jnp.float32)

    out = jnp.maximum(acc + b_ref[...], 0.0)            # bias + ReLU
    o_ref[0] = out.reshape(Ho, Wo, Co).astype(o_ref.dtype)


# --------------------------------------------------------------------------
# Wrapper
# --------------------------------------------------------------------------
def downsample_block2d(x_nchw, params, scale_hw=(2, 2), eps=EPS, tile_rows=2048):
    w1 = params["w1"]          # (Co, Ci)        torch Conv2d(1x1) weight (squeezed)
    gamma = params["gamma"]    # (Co,)
    beta = params["beta"]      # (Co,)
    w2 = params["w2"]          # (Co, Co, 3, 3)  torch layout (out, in, kh, kw)
    b2 = params["b2"]          # (Co,)

    N, Ci, H, W = x_nchw.shape
    Co = w1.shape[0]
    sh, sw = scale_hw
    assert sh == 2 and sw == 2, "stride-phase decomposition assumes stride (2, 2)"
    assert H % 2 == 0 and W % 2 == 0, "kernel assumes even spatial dims"
    Ho, Wo = H // 2, W // 2

    # ---- kernel 1: 1x1 conv + partial per-channel sum / sum-of-squares -----
    x_nhwc = jnp.transpose(x_nchw, (0, 2, 3, 1))
    R = N * H * W
    x_flat = x_nhwc.reshape(R, Ci).astype(jnp.bfloat16)
    T = max(8, _round_up(min(tile_rows, R), 8))
    G = pl.cdiv(R, T)
    Rp = G * T
    if Rp != R:
        x_flat = jnp.pad(x_flat, ((0, Rp - R), (0, 0)))      # zero rows: no stat bias
    w1_mat = jnp.transpose(w1, (1, 0)).astype(jnp.bfloat16)  # (Ci, Co)

    x1_flat, stats = pl.pallas_call(
        _pointwise_stats_kernel,
        out_shape=(jax.ShapeDtypeStruct((Rp, Co), jnp.bfloat16),
                   jax.ShapeDtypeStruct((G, 2, Co), jnp.float32)),
        grid=(G,),
        in_specs=[pl.BlockSpec((T, Ci), lambda i: (i, 0)),
                  pl.BlockSpec((Ci, Co), lambda i: (0, 0))],
        out_specs=(pl.BlockSpec((T, Co), lambda i: (i, 0)),
                   pl.BlockSpec((1, 2, Co), lambda i: (i, 0, 0))),
        compiler_params=pltpu.CompilerParams(
            dimension_semantics=("parallel",),
            vmem_limit_bytes=_VMEM_LIMIT_BYTES),
    )(x_flat, w1_mat)

    # ---- BatchNorm2d statistics (training mode, biased variance) -----------
    cnt = float(R)
    mean = stats[:, 0, :].sum(axis=0) / cnt
    var = jnp.maximum(stats[:, 1, :].sum(axis=0) / cnt - mean * mean, 0.0)
    bn_scale = gamma.astype(jnp.float32) * jax.lax.rsqrt(var + eps)     # (Co,)
    bn_shift = beta.astype(jnp.float32) - mean * bn_scale               # (Co,)

    x1 = x1_flat[:R].reshape(N, H, W, Co)
    # torch conv: out[o] = sum_{c,kh,kw} w2[o,c,kh,kw] * xp[c, 2i+kh, 2j+kw]
    w2_mat = jnp.transpose(w2, (2, 3, 1, 0)).reshape(9, Co, Co).astype(jnp.bfloat16)

    conv_kernel = functools.partial(_norm_conv_relu_kernel, Ho=Ho, Wo=Wo, Co=Co)
    out = pl.pallas_call(
        conv_kernel,
        out_shape=jax.ShapeDtypeStruct((N, Ho, Wo, Co), jnp.float32),
        grid=(N,),
        in_specs=[pl.BlockSpec((1, H, W, Co), lambda n: (n, 0, 0, 0)),
                  pl.BlockSpec((1, 1, Co), lambda n: (0, 0, 0)),
                  pl.BlockSpec((1, 1, Co), lambda n: (0, 0, 0)),
                  pl.BlockSpec((9, Co, Co), lambda n: (0, 0, 0)),
                  pl.BlockSpec((1, Co), lambda n: (0, 0))],
        out_specs=pl.BlockSpec((1, Ho, Wo, Co), lambda n: (n, 0, 0, 0)),
        scratch_shapes=[pltpu.VMEM((Ho + 1, Wo + 8, Co), jnp.bfloat16),  # p00
                        pltpu.VMEM((Ho + 1, Wo, Co), jnp.bfloat16),      # p01
                        pltpu.VMEM((Ho, Wo + 8, Co), jnp.bfloat16),      # p10
                        pltpu.VMEM((Ho, Wo, Co), jnp.bfloat16)],         # p11
        compiler_params=pltpu.CompilerParams(
            dimension_semantics=("parallel",),
            vmem_limit_bytes=_VMEM_LIMIT_BYTES),
    )(x1, bn_scale.reshape(1, 1, Co), bn_shift.reshape(1, 1, Co),
      w2_mat, b2.reshape(1, Co).astype(jnp.float32))

    # TODO(synk): emit NCHW directly from kernel 2 (in-kernel XLU transpose) to
    # drop this extra HBM pass.
    return jnp.transpose(out, (0, 3, 1, 2))                   # back to NCHW


# --------------------------------------------------------------------------
# Pure-JAX reference (mirrors the PyTorch forward).  compute_dtype=bfloat16
# rounds the matmul operands at the same points the kernel does (so that
# comparison only differs by accumulation order); float32 is the exact ref.
# --------------------------------------------------------------------------
def reference(x_nchw, params, scale_hw, eps=EPS, compute_dtype=jnp.float32):
    w1, gamma, beta, w2, b2 = (params[k] for k in ("w1", "gamma", "beta", "w2", "b2"))
    cd, f32 = compute_dtype, jnp.float32
    hi = jax.lax.Precision.HIGHEST
    x1 = jnp.einsum("nchw,oc->nohw",
                    x_nchw.astype(cd).astype(f32), w1.astype(cd).astype(f32),
                    precision=hi)
    if cd != f32:
        x1 = x1.astype(cd).astype(f32)           # kernel stores x1 in bf16
    mean = x1.mean(axis=(0, 2, 3), keepdims=True)
    var = x1.var(axis=(0, 2, 3), keepdims=True)  # biased (training-mode BN)
    xn = (x1 - mean) / jnp.sqrt(var + eps)
    xn = xn * gamma.reshape(1, -1, 1, 1) + beta.reshape(1, -1, 1, 1)
    xp = jnp.pad(xn.astype(cd).astype(f32), ((0, 0), (0, 0), (1, 1), (1, 1)))
    y = jax.lax.conv_general_dilated(
        xp, w2.astype(cd).astype(f32), window_strides=scale_hw, padding="VALID",
        dimension_numbers=("NCHW", "OIHW", "NCHW"), precision=hi)
    y = y + b2.reshape(1, -1, 1, 1)
    return jnp.maximum(y, 0.0)


if __name__ == "__main__":
    N, Ci, Co, H, W = 2, 4, 8, 16, 16
    scale_hw = (2, 2)

    key = jax.random.PRNGKey(0)
    kx, kw1, kw2, kb2 = jax.random.split(key, 4)

    x = jax.random.normal(kx, (N, Ci, H, W), dtype=jnp.float32)
    params = {
        "w1": jax.random.normal(kw1, (Co, Ci), dtype=jnp.float32) * 0.5,
        "gamma": jnp.ones((Co,), jnp.float32),      # PyTorch BatchNorm2d default
        "beta": jnp.zeros((Co,), jnp.float32),      # PyTorch BatchNorm2d default
        "w2": jax.random.normal(kw2, (Co, Co, 3, 3), dtype=jnp.float32) * 0.2,
        "b2": jax.random.normal(kb2, (Co,), dtype=jnp.float32) * 0.1,
    }

    # small tile_rows so the multi-tile partial-stats path is exercised (G=4)
    out = jax.block_until_ready(
        downsample_block2d(x, params, scale_hw=scale_hw, tile_rows=128))
    assert out.shape == (N, Co, H // 2, W // 2)

    # Tight structural check: reference with bf16 operand rounding at the same
    # points as the kernel -> differences are accumulation order only.
    ref_b = jax.block_until_ready(
        reference(x, params, scale_hw, compute_dtype=jnp.bfloat16))
    np.testing.assert_allclose(np.asarray(out), np.asarray(ref_b),
                               rtol=5e-3, atol=5e-3)

    # Loose check vs the exact f32 reference (gap = bf16 operand rounding).
    ref_f = jax.block_until_ready(reference(x, params, scale_hw))
    np.testing.assert_allclose(np.asarray(out), np.asarray(ref_f),
                               rtol=1e-1, atol=1e-1)

    print("KERNEL_OK")
</pallas_src>

<mosaic_0001>
module attributes {stable_mosaic.version = 11 : i64} {
  func.func @_pointwise_stats_kernel(%arg0: i32, %arg1: memref<128x4xbf16, #tpu.memory_space<vmem>>, %arg2: memref<4x8xbf16, #tpu.memory_space<vmem>>, %arg3: memref<128x8xbf16, #tpu.memory_space<vmem>>, %arg4: memref<1x2x8xf32, #tpu.memory_space<vmem>>) attributes {dimension_semantics = [#tpu.dimension_semantics<parallel>], iteration_bounds = array<i64: 4>, scalar_prefetch = 0 : i64, scratch_operands = 0 : i64, tpu.core_type = #tpu.core_type<tc>, window_params = [{transform_indices = @transform_0, window_bounds = array<i64: 128, 4>}, {pipeline_mode = #tpu.pipeline_mode<synchronous>, transform_indices = @transform_1, window_bounds = array<i64: 4, 8>}, {transform_indices = @transform_2, window_bounds = array<i64: 128, 8>}, {transform_indices = @transform_3, window_bounds = array<i64: 1, 2, 8>}]} {
    %c0 = arith.constant 0 : index
    %c0_0 = arith.constant 0 : index
    %0 = vector.load %arg1[%c0, %c0_0] : memref<128x4xbf16, #tpu.memory_space<vmem>>, vector<128x4xbf16>
    %c0_1 = arith.constant 0 : index
    %c0_2 = arith.constant 0 : index
    %1 = vector.load %arg2[%c0_1, %c0_2] : memref<4x8xbf16, #tpu.memory_space<vmem>>, vector<4x8xbf16>
    %cst = arith.constant dense<0.000000e+00> : vector<128x8xf32>
    %2 = tpu.matmul %0, %1, %cst {dimension_numbers = #tpu.dot_dimension_numbers<[1], [0], [0], [1], [0, 0, 1, 1], [], []>} : vector<128x4xbf16>, vector<4x8xbf16>, vector<128x8xf32> -> vector<128x8xf32>
    %3 = arith.truncf %2 : vector<128x8xf32> to vector<128x8xbf16>
    %c0_3 = arith.constant 0 : index
    %c0_4 = arith.constant 0 : index
    %4 = vector.load %arg3[%c0_3, %c0_4] : memref<128x8xbf16, #tpu.memory_space<vmem>>, vector<128x8xbf16>
    tpu.vector_store %arg3[%c0_3, %c0_4], %3 {strides = array<i32>} : memref<128x8xbf16, #tpu.memory_space<vmem>>, vector<128x8xbf16>,
    %5 = arith.extf %3 : vector<128x8xbf16> to vector<128x8xf32>
    %cst_5 = arith.constant dense<0.000000e+00> : vector<8xf32>
    %6 = vector.multi_reduction <add>, %5, %cst_5 [0] : vector<128x8xf32> to vector<8xf32>
    %7 = vector.shape_cast %6 : vector<8xf32> to vector<1x8xf32>
    %8 = arith.mulf %5, %5 : vector<128x8xf32>
    %cst_6 = arith.constant dense<0.000000e+00> : vector<8xf32>
    %9 = vector.multi_reduction <add>, %8, %cst_6 [0] : vector<128x8xf32> to vector<8xf32>
    %10 = vector.shape_cast %9 : vector<8xf32> to vector<1x8xf32>
    %11 = tpu.concatenate %7, %10 in 0 : vector<1x8xf32>, vector<1x8xf32> -> vector<2x8xf32>
    %c0_7 = arith.constant 0 : index
    %c0_8 = arith.constant 0 : index
    %c0_9 = arith.constant 0 : index
    %12 = vector.load %arg4[%c0_7, %c0_8, %c0_9] : memref<1x2x8xf32, #tpu.memory_space<vmem>>, vector<1x2x8xf32>
    %13 = vector.shape_cast %12 : vector<1x2x8xf32> to vector<2x8xf32>
    %14 = vector.shape_cast %11 : vector<2x8xf32> to vector<1x2x8xf32>
    tpu.vector_store %arg4[%c0_7, %c0_8, %c0_9], %14 {strides = array<i32>} : memref<1x2x8xf32, #tpu.memory_space<vmem>>, vector<1x2x8xf32>,
    return
  }
  func.func @transform_0(%arg0: i32) -> (i32, i32) {
    %c0_i32 = arith.constant 0 : i32
    %c0_i32_0 = arith.constant 0 : i32
    return %arg0, %c0_i32 : i32, i32
  }
  func.func @transform_1(%arg0: i32) -> (i32, i32) {
    %c0_i32 = arith.constant 0 : i32
    %c0_i32_0 = arith.constant 0 : i32
    %c0_i32_1 = arith.constant 0 : i32
    return %c0_i32, %c0_i32_0 : i32, i32
  }
  func.func @transform_2(%arg0: i32) -> (i32, i32) {
    %c0_i32 = arith.constant 0 : i32
    %c0_i32_0 = arith.constant 0 : i32
    return %arg0, %c0_i32 : i32, i32
  }
  func.func @transform_3(%arg0: i32) -> (i32, i32, i32) {
    %c0_i32 = arith.constant 0 : i32
    %c0_i32_0 = arith.constant 0 : i32
    %c0_i32_1 = arith.constant 0 : i32
    return %arg0, %c0_i32, %c0_i32_0 : i32, i32, i32
  }
}

</mosaic_0001>

<bundles_post_ra>
// kernel: tpu_custom_call.1
= control target key start
LH: loop header
LB: loop body
LE: loop exit
PB: predicated region body
PF: predicated region fallthrough
CT: control target
= control target key end

     0   :  { %9 = vsyncpa [#allocation3], 0  ;;  %s1067_s0 = inlined_call_operand.vmem [shape: bf16[512,4], index: 0, kind: input, shape index: {}]   ;;  %s1068_s1 = inlined_call_operand.vmem [shape: bf16[4,8], index: 1, kind: input, shape index: {}]   ;;  %s1069_s2 = inlined_call_operand.vmem [shape: bf16[512,8], index: 2, kind: output, shape index: {0}]   ;;  %s1070_s3 = inlined_call_operand.hbm [shape: f32[4,2,8], index: 3, kind: output, shape index: {1}]  }
   0x1   :  { %11 = vsyncpa [#allocation3 + $0x1], 0  ;;  %s890_s12 = smov 0   ;;  %s892_s13 = smov 0  }
   0x2   :  { %s894_s14 = smov 0   ;;  %s896_s15 = smov 0  }
   0x3 LB: > { %s911_s16 = sadd.s32 4294967295, %s867_s15   ;;  %s668_s17 = sadd.s32 4294967294, %s867_s15   ;;  %s867_s15 = sphi %s896_s15, %s1076_s15   ;;  %s863_s14 = sphi %s894_s14, %s1075_s14   ;;  %s859_s13 = sphi %s892_s13, %s1074_s13   ;;  %s855_s12 = sphi %s890_s12, %s1073_s12  }
   0x4   : > { %s915_s18 = sadd.s32 1, %s867_s15   ;;  %s97_s19 = sadd.s32 1, %s863_s14 }
   0x5   : > { %s94_s20 = ssub.s32 %s867_s15, %s915_s18  ;;  %p107_p0 = scmp.ne.s32.totalorder %s863_s14, %s859_s13 }
   0x6   : > { %p95_p1 = scmp.eq.s32.totalorder %s94_s20, 0  ;;  %p108_p2 = scmp.eq.s32.totalorder %s911_s16, 3 }
   0x7   : > { %p113_p3 = scmp.ne.s32.totalorder %s859_s13, %s855_s12  ;;  %p114_p4 = scmp.eq.s32.totalorder %s668_s17, 3 }
   0x8   : > { %s926_s21 = scalar_select %p95_p1, %s863_s14, %s97_s19  }
   0x9   : > { %p928_p5 = por %p108_p2, %p107_p0  ;;  %p932_p6 = por %p114_p4, %p113_p3 }
   0xa   : > { %p671_p7 = scmp.ge.s32.totalorder %s867_s15, 1  ;;  %p144_p8 = scmp.lt.s32.totalorder %s867_s15, 5 }
   0xc   : > { %p145_p9 = pnand %p671_p7, %p144_p8 }
   0xd   : > { %s673_s26 = sshll.u32 (!%p145_p9), %s911_s16, 4  ;;  %s170_s7 = sand.u32 (!%p145_p9), 1, %s859_s13  }
   0xe   : > { %148 = sbr.rel (%p145_p9) target bundleno = 288 (0x120), region = 28  ;;  %p174_p10 = scmp.lt.s32.totalorder (!%p145_p9), %s673_s26, 63 }
   0xf   : > { %s672_s8 = sshll.u32 (!%p145_p9), %s170_s7, 1  ;;  %s710_s9 = sshll.u32 (!%p145_p9), %s911_s16, 5 }
  0x10   : > { %s172_s10 = scalar_lea.vmem (!%p145_p9), [#allocation2], %s672_s8  ;;  %s1032_s20 = scalar_lea.hbm (!%p145_p9), %s1070_s3, %s710_s9 }
  0x11   : > { %s584_s11 = sshll.u32 (!%p145_p9), %s172_s10, 4  ;;  %s567_s24 = scalar_lea.sflag (!%p145_p9), [#allocation3], %s170_s7  ;;  %s585_s11 = int_to_ptr.vmem [resolvable:$true] %s584_s11 }
  0x12   : > { %s807_s25 = scalar_lea.vmem (!%p145_p9), %s585_s11, 32  ;;  %s869_s16 = smov (!%p145_p9), [#allocation2]  }
  0x13   : > { %v202_v0 = vld [vmem:[%s1068_s1] sm:$0x3]  ;;  %vm268_vm0 = vcmask 1041408   ;;  %s1078_s26 = smov (!%p174_p10, %s673_s26), 63  ;;  %vm243_vm1 = vcmask 31744   ;;  %vm433_vm2 = vcmask 60416   ;;  %p808_p11 = scmp.ne.s32.totalorder %s585_s11, %s807_s25 }
  0x14   : > { %758 = vmatprep.subr.msk.bf16.mxu0 %vm268_vm0, %v202_v0  ;;  %v270_v1 = vsel %vm268_vm0, %v202_v0, 0  ;;  %759 = vmatprep.subr.msk.bf16.mxu1 %vm268_vm0, %v202_v0  ;;  %s674_s27 = sshll.u32 %s1078_s26, 2  ;;  %vm466_vm3 = vcmask 64512   ;;  %vm557_vm4 = vcmask 1040384   ;;  %vm559_vm5 = vcmask 58368   ;;  %s811_s26 = sshll.u32 %s869_s16, 4  ;;  %s812_s26 = int_to_ptr.vmem [resolvable:$false] %s811_s26 }
  0x15   : > { %739 = vmatpush3.bf16.msra.mxu0 %v270_v1  ;;  %757 = vmatpush3.bf16.msra.mxu1 %v270_v1  ;;  %s177_s30 = scalar_lea.vmem %s1067_s0, %s674_s27  ;;  %s956_s6 = scalar_lea.vmem %s1069_s2, %s674_s27 }
  0x16   : > { %v799_v2 = vld [vmem:[%s177_s30] sm:$0xff]   ;;  %v800_v3 = vld [vmem:[%s177_s30 + $0x8] sm:$0xff]   ;;  %v801_v4 = vld [vmem:[%s177_s30 + $0x10] sm:$0xff]   ;;  %p809_p12 = pnand %p808_p11, %p928_p5  ;;  %s813_s27 = scalar_lea.vmem %s812_s26, 64 }
  0x17   : > { %740 = vmatprep.mubr.msk.bf16.mxu0 %vm243_vm1, %v799_v2  ;;  %v803_v5 = vld [vmem:[%s177_s30 + $0x20] sm:$0xff]   ;;  %v804_v6 = vld [vmem:[%s177_s30 + $0x28] sm:$0xff]   ;;  %v805_v7 = vld [vmem:[%s177_s30 + $0x30] sm:$0xff]   ;;  %p814_p0 = scmp.lt.s32.totalorder %s585_s11, %s812_s26  ;;  %p815_p1 = scmp.lt.s32.totalorder %s813_s27, %s807_s25 }
  0x18   : > { %741 = vmatmul.mubr.msk.bf16.vlgmr.msra.gmra.mxu0 %vm243_vm1, %v800_v3  ;;  %748 = vmatprep.mubr.msk.bf16.mxu1 %vm243_vm1, %v803_v5  ;;  %v802_v8 = vld [vmem:[%s177_s30 + $0x18] sm:$0xff]   ;;  %p810_p13 = pneg %p809_p12 }
  0x19   : > { %744 = vmatprep.mubr.msk.bf16.mxu0 %vm243_vm1, %v801_v4  ;;  %749 = vmatmul.mubr.msk.bf16.vlgmr.msra.gmra.mxu1 %vm243_vm1, %v804_v6  ;;  %v806_v9 = vld [vmem:[%s177_s30 + $0x38] sm:$0xff]   ;;  %p816_p2 = por %p815_p1, %p814_p0 }
  0x1a   : > { %752 = vmatprep.mubr.msk.bf16.mxu1 %vm243_vm1, %v805_v7 }
  0x1b   : > { %p817_p3 = pnand %p816_p2, %p810_p13 }
  0x20   : > { %745 = vmatmul.mubr.msk.bf16.gmra.mxu0 %vm243_vm1, %v802_v8 }
  0x21   : > { %753 = vmatmul.mubr.msk.bf16.gmra.mxu1 %vm243_vm1, %v806_v9 }
  0xd8   : > { %v742_v10 = vpop.f32.mrf.mxu0 }
  0xd9   : > { %v715_v11 = vpack.c.bf16 %v742_v10, %v742_v10  ;;  %v750_v15 = vpop.f32.mrf.mxu1 }
  0xda   : > { %v306_v12 = vpop.f32.mrf.mxu0  ;;  %v723_v18 = vpack.c.bf16 %v750_v15, %v750_v15 }
  0xdb   : > { %436 = vst.msk [vmem:[%s956_s6 + $0x8] sm:$0xf] %vm433_vm2, %v715_v11  ;;  %v713_v13 = vpack.c.bf16 %v306_v12, %v306_v12  ;;  %v338_v20 = vpop.f32.mrf.mxu1 }
  0xdc   : > { %v743_v14 = vpop.f32.mrf.mxu0  ;;  %444 = vst.msk [vmem:[%s956_s6 + $0x28] sm:$0xf] %vm433_vm2, %v723_v18  ;;  %v721_v25 = vpack.c.bf16 %v338_v20, %v338_v20 }
  0xdd   : > { %434 = vst.msk [vmem:[%s956_s6] sm:$0xf] %vm433_vm2, %v713_v13  ;;  %v370_v16 = vpack.c.bf16 %v743_v14, %v742_v10  ;;  %v716_v17 = vpack.c.bf16 %v743_v14, %v743_v14  ;;  %v751_v26 = vpop.f32.mrf.mxu1 }
  0xde   : > { %v309_v19 = vpop.f32.mrf.mxu0  ;;  %442 = vst.msk [vmem:[%s956_s6 + $0x20] sm:$0xf] %vm433_vm2, %v721_v25  ;;  %v724_v35 = vpack.c.bf16 %v751_v26, %v751_v26  ;;  %v374_v63 = vpack.c.bf16 %v751_v26, %v750_v15 }
  0xdf   : > { %437 = vst.msk [vmem:[%s956_s6 + $0xc] sm:$0xf] %vm433_vm2, %v716_v17  ;;  %v452_v21 = vunpack.c.l.bf16 %v370_v16  ;;  %v369_v22 = vpack.c.bf16 %v309_v19, %v306_v12  ;;  %v714_v23 = vpack.c.bf16 %v309_v19, %v309_v19  ;;  %v341_v31 = vpop.f32.mrf.mxu1  ;;  %v453_v32 = vunpack.c.h.bf16 %v370_v16 }
  0xe0   : > { %v746_v24 = vpop.f32.mrf.mxu0  ;;  %445 = vst.msk [vmem:[%s956_s6 + $0x2c] sm:$0xf] %vm433_vm2, %v724_v35  ;;  %v373_v61 = vpack.c.bf16 %v341_v31, %v338_v20  ;;  %v722_v11 = vpack.c.bf16 %v341_v31, %v341_v31  ;;  %v460_v15 = vunpack.c.l.bf16 %v374_v63  ;;  %v461_v31 = vunpack.c.h.bf16 %v374_v63 }
  0xe1   : > { %435 = vst.msk [vmem:[%s956_s6 + $0x4] sm:$0xf] %vm433_vm2, %v714_v23  ;;  %v450_v27 = vunpack.c.l.bf16 %v369_v22  ;;  %v451_v28 = vunpack.c.h.bf16 %v369_v22  ;;  %v719_v29 = vpack.c.bf16 %v746_v24, %v746_v24  ;;  %v506_v33 = vmul.f32 %v452_v21, %v452_v21  ;;  %v974_v41 = vpop.f32.mrf.mxu1 }
  0xe2   : > { %v322_v30 = vpop.f32.mrf.mxu0  ;;  %v470_v45 = vsel %vm466_vm3, %v452_v21, 0.0  ;;  %v507_v52 = vmul.f32 %v453_v32, %v453_v32  ;;  %v472_v58 = vsel %vm466_vm3, %v453_v32, 0.0  ;;  %v458_v12 = vunpack.c.l.bf16 %v373_v61  ;;  %443 = vst.msk [vmem:[%s956_s6 + $0x24] sm:$0xf] %vm433_vm2, %v722_v11 }
  0xe3   : > { %v717_v34 = vpack.c.bf16 %v322_v30, %v322_v30  ;;  %v467_v36 = vsel %vm466_vm3, %v450_v27, 0.0  ;;  %v468_v37 = vsel %vm466_vm3, %v451_v28, 0.0  ;;  %v504_v38 = vmul.f32 %v450_v27, %v450_v27  ;;  %440 = vst.msk [vmem:[%s956_s6 + $0x18] sm:$0xf] %vm433_vm2, %v719_v29  ;;  %v354_v51 = vpop.f32.mrf.mxu1 }
  0xe4   : > { %v505_v39 = vmul.f32 %v451_v28, %v451_v28  ;;  %v747_v40 = vpop.f32.mrf.mxu0  ;;  %v469_v42 = vadd.f32 %v468_v37, %v467_v36  ;;  %v523_v53 = vsel %vm466_vm3, %v506_v33, 0.0  ;;  %v525_v1 = vsel %vm466_vm3, %v507_v52, 0.0 }
  0xe5   : > { %438 = vst.msk [vmem:[%s956_s6 + $0x10] sm:$0xf] %vm433_vm2, %v717_v34  ;;  %v372_v43 = vpack.c.bf16 %v747_v40, %v746_v24  ;;  %v720_v44 = vpack.c.bf16 %v747_v40, %v747_v40  ;;  %v520_v46 = vsel %vm466_vm3, %v504_v38, 0.0  ;;  %v755_v0 = vpop.f32.mrf.mxu1  ;;  %v727_v16 = vpack.c.bf16 %v974_v41, %v974_v41 }
  0xe6   : > { %v521_v47 = vsel %vm466_vm3, %v505_v39, 0.0  ;;  %v325_v48 = vpop.f32.mrf.mxu0  ;;  %v471_v49 = vadd.f32 %v470_v45, %v469_v42  ;;  %v459_v21 = vunpack.c.h.bf16 %v373_v61  ;;  %v725_v25 = vpack.c.bf16 %v354_v51, %v354_v51 }
  0xe7   : > { %v522_v50 = vadd.f32 %v521_v47, %v520_v46  ;;  %441 = vst.msk [vmem:[%s956_s6 + $0x1c] sm:$0xf] %vm433_vm2, %v720_v44  ;;  %v371_v54 = vpack.c.bf16 %v325_v48, %v322_v30  ;;  %v718_v55 = vpack.c.bf16 %v325_v48, %v325_v48  ;;  %v456_v57 = vunpack.c.l.bf16 %v372_v43  ;;  %v357_v17 = vpop.f32.mrf.mxu1  ;;  %448 = vst.msk [vmem:[%s956_s6 + $0x38] sm:$0xf] %vm433_vm2, %v727_v16 }
  0xe8   : > { %v473_v62 = vadd.f32 %v472_v58, %v471_v49  ;;  %v457_v2 = vunpack.c.h.bf16 %v372_v43  ;;  %v512_v27 = vmul.f32 %v458_v12, %v458_v12  ;;  %v728_v28 = vpack.c.bf16 %v755_v0, %v755_v0  ;;  %446 = vst.msk [vmem:[%s956_s6 + $0x30] sm:$0xf] %vm433_vm2, %v725_v25 }
  0xe9   : > { %v524_v56 = vadd.f32 %v523_v53, %v522_v50  ;;  %439 = vst.msk [vmem:[%s956_s6 + $0x14] sm:$0xf] %vm433_vm2, %v718_v55  ;;  %v454_v59 = vunpack.c.l.bf16 %v371_v54  ;;  %v455_v60 = vunpack.c.h.bf16 %v371_v54  ;;  %v510_v5 = vmul.f32 %v456_v57, %v456_v57 }
  0xea   : > { %v478_v18 = vsel %vm466_vm3, %v456_v57, 0.0  ;;  %v511_v19 = vmul.f32 %v457_v2, %v457_v2  ;;  %v480_v22 = vsel %vm466_vm3, %v457_v2, 0.0  ;;  %v375_v29 = vpack.c.bf16 %v357_v17, %v354_v51  ;;  %449 = vst.msk [vmem:[%s956_s6 + $0x3c] sm:$0xf] %vm433_vm2, %v728_v28 }
  0xeb   : > { %v474_v3 = vsel %vm466_vm3, %v454_v59, 0.0  ;;  %v508_v4 = vmul.f32 %v454_v59, %v454_v59  ;;  %v509_v7 = vmul.f32 %v455_v60, %v455_v60  ;;  %v526_v8 = vadd.f32 %v525_v1, %v524_v56 }
  0xec   : > { %v475_v6 = vadd.f32 %v474_v3, %v473_v62  ;;  %v476_v9 = vsel %vm466_vm3, %v455_v60, 0.0  ;;  %v531_v26 = vsel %vm466_vm3, %v510_v5, 0.0  ;;  %v533_v33 = vsel %vm466_vm3, %v511_v19, 0.0 }
  0xed   : > { %v527_v10 = vsel %vm466_vm3, %v508_v4, 0.0  ;;  %v529_v20 = vsel %vm466_vm3, %v509_v7, 0.0  ;;  %v482_v34 = vsel %vm466_vm3, %v458_v12, 0.0  ;;  %v513_v35 = vmul.f32 %v459_v21, %v459_v21 }
  0xee   : > { %v477_v13 = vadd.f32 %v476_v9, %v475_v6  ;;  %v528_v14 = vadd.f32 %v527_v10, %v526_v8  ;;  %v726_v36 = vpack.c.bf16 %v357_v17, %v357_v17  ;;  %v514_v37 = vmul.f32 %v460_v15, %v460_v15 }
  0xef   : > { %v484_v40 = vsel %vm466_vm3, %v459_v21, 0.0  ;;  %v535_v42 = vsel %vm466_vm3, %v512_v27, 0.0  ;;  %v376_v43 = vpack.c.bf16 %v755_v0, %v974_v41  ;;  %v462_v44 = vunpack.c.l.bf16 %v375_v29 }
  0xf0   : > { %v479_v23 = vadd.f32 %v478_v18, %v477_v13  ;;  %v530_v24 = vadd.f32 %v529_v20, %v528_v14  ;;  %447 = vst.msk [vmem:[%s956_s6 + $0x34] sm:$0xf] %vm433_vm2, %v726_v36  ;;  %v486_v47 = vsel %vm466_vm3, %v460_v15, 0.0  ;;  %v515_v48 = vmul.f32 %v461_v31, %v461_v31 }
  0xf1   : > { %v537_v49 = vsel %vm466_vm3, %v513_v35, 0.0  ;;  %v463_v50 = vunpack.c.h.bf16 %v375_v29  ;;  %v488_v53 = vsel %vm466_vm3, %v461_v31, 0.0  ;;  %v539_v54 = vsel %vm466_vm3, %v514_v37, 0.0 }
  0xf2   : > { %v532_v30 = vadd.f32 %v531_v26, %v530_v24  ;;  %v481_v32 = vadd.f32 %v480_v22, %v479_v23  ;;  %v464_v55 = vunpack.c.l.bf16 %v376_v43  ;;  %v516_v56 = vmul.f32 %v462_v44, %v462_v44 }
  0xf3   : > { %v541_v58 = vsel %vm466_vm3, %v515_v48, 0.0  ;;  %v465_v59 = vunpack.c.h.bf16 %v376_v43  ;;  %v490_v60 = vsel %vm466_vm3, %v462_v44, 0.0  ;;  %v517_v61 = vmul.f32 %v463_v50, %v463_v50 }
  0xf4   : > { %v483_v38 = vadd.f32 %v482_v34, %v481_v32  ;;  %v534_v39 = vadd.f32 %v533_v33, %v532_v30  ;;  %v518_v0 = vmul.f32 %v464_v55, %v464_v55  ;;  %v492_v1 = vsel %vm466_vm3, %v463_v50, 0.0 }
  0xf5   : > { %v543_v2 = vsel %vm466_vm3, %v516_v56, 0.0  ;;  %v494_v5 = vsel %vm466_vm3, %v464_v55, 0.0  ;;  %v519_v6 = vmul.f32 %v465_v59, %v465_v59  ;;  %v545_v7 = vsel %vm466_vm3, %v517_v61, 0.0 }
  0xf6   : > { %v485_v45 = vadd.f32 %v484_v40, %v483_v38  ;;  %v536_v46 = vadd.f32 %v535_v42, %v534_v39  ;;  %v496_v10 = vsel %vm466_vm3, %v465_v59, 0.0  ;;  %v547_v11 = vsel %vm466_vm3, %v518_v0, 0.0 }
  0xf7   : > { %v549_v14 = vsel %vm466_vm3, %v519_v6, 0.0 }
  0xf8   : > { %v487_v51 = vadd.f32 %v486_v47, %v485_v45  ;;  %v538_v52 = vadd.f32 %v537_v49, %v536_v46 }
  0xfa   : > { %v540_v41 = vadd.f32 %v539_v54, %v538_v52  ;;  %v489_v57 = vadd.f32 %v488_v53, %v487_v51 }
  0xfc   : > { %v491_v62 = vadd.f32 %v490_v60, %v489_v57  ;;  %v542_v63 = vadd.f32 %v541_v58, %v540_v41 }
  0xfe   : > { %v493_v3 = vadd.f32 %v492_v1, %v491_v62  ;;  %v544_v4 = vadd.f32 %v543_v2, %v542_v63 }
 0x100   : > { %v495_v8 = vadd.f32 %v494_v5, %v493_v3  ;;  %v546_v9 = vadd.f32 %v545_v7, %v544_v4 }
 0x102   : > { %v497_v12 = vadd.f32 %v496_v10, %v495_v8  ;;  %v548_v13 = vadd.f32 %v547_v11, %v546_v9 }
 0x104   : > { %v498_v15 = vrot.slane %v497_v12, 4  ;;  %v550_v16 = vadd.f32 %v549_v14, %v548_v13 }
 0x106   : > { %v499_v17 = vadd.f32 %v498_v15, %v497_v12  ;;  %v551_v18 = vrot.slane %v550_v16, 4 }
 0x108   : > { %v500_v19 = vrot.slane %v499_v17, 2  ;;  %v552_v20 = vadd.f32 %v551_v18, %v550_v16 }
 0x10a   : > { %v501_v21 = vadd.f32 %v500_v19, %v499_v17  ;;  %v553_v22 = vrot.slane %v552_v20, 2 }
 0x10c   : > { %v502_v23 = vrot.slane %v501_v21, 1  ;;  %v554_v24 = vadd.f32 %v553_v22, %v552_v20 }
 0x10e   : > { %v555_v25 = vrot.slane %v554_v24, 1  ;;  %v503_v26 = vadd.f32 %v502_v23, %v501_v21 }
 0x110   : > { %v556_v27 = vadd.f32 %v555_v25, %v554_v24 }
 0x112   : > { %v558_v28 = vsel %vm557_vm4, %v503_v26, %v556_v27 }
 0x113   : > { %560 = vst.msk [vmem:[%s172_s10] sm:$0x3] %vm559_vm5, %v558_v28 }
 0x114   : > { %820 = shalt.err (!%p817_p3)
}
 0x115   : > { %s821_s28 = scalar_lea.hbm %s1032_s20, 32  ;;  %s825_s4 = scalar_lea.hbm %s1070_s3, 128 }
 0x116   : > { %p822_p4 = scmp.ne.s32.totalorder %s1032_s20, %s821_s28  ;;  %p826_p9 = scmp.lt.s32.totalorder %s1032_s20, %s1070_s3 }
 0x117   : > { %p827_p10 = scmp.lt.s32.totalorder %s825_s4, %s821_s28 }
 0x118   : > { %p823_p7 = pnand %p822_p4, %p928_p5 }
 0x119   : > { %p828_p11 = por %p827_p10, %p826_p9 }
 0x11a   : > { %p824_p8 = pneg %p823_p7 }
 0x11c   : > { %p829_p12 = pnand %p828_p11, %p824_p8 }
 0x11e   : > { %832 = shalt.err (!%p829_p12)
}
 0x11f   : > { %760 = dma.vmem_to_hbm [thread:$0]  (%p928_p5), %s585_s11, 32, %s1032_s20, %s567_s24  }
 0x120 PF: > { %p766_p13 = scmp.ge.s32.totalorder %s867_s15, 2  ;;  %s604_s7 = sand.u32 1, %s855_s12  }
 0x121   : > { %s605_s8 = scalar_lea.sflag [#allocation3], %s604_s7 }
 0x122   : > { %p763_p0 = pnand %p766_p13, %p932_p6 }
 0x124   : > { %p764_p1 = pneg %p763_p0 }
 0x126   : > { %850 = dma.done.wait (%p764_p1), %s605_s8, 32  }
 0x127   : > { %852 = vsyncadd (%p764_p1), %s605_s8, 4294967264  ;;  %p14_p2 = scmp.ge.s32.totalorder %s915_s18, 6   ;;  %s1073_s12 = smov %s859_s13 }
 0x128   : > { %s1074_s13 = smov %s863_s14  ;;  %s1075_s14 = smov %s926_s21 }
 0x129   : > { %s1076_s15 = smov %s915_s18  ;;  %16 = sbr.rel (!%p14_p2) target bundleno = 3 (0x3), region = 75 }
 0x12e   :  { %610 = vsyncpa [#allocation3], 1 }
 0x12f   :  { %612 = vsyncpa [#allocation3 + $0x1], 1 }

</bundles_post_ra>
